<compile_context>
chip_gen: v7x
topology: tpu7x:2x2x1
jax: 0.10.0
libtpu: 0.0.40
codegen_flags: <defaults>
</compile_context>

<pallas_src>
import functools
import math

import jax
import jax.numpy as jnp
from jax.experimental import pallas as pl
from jax.experimental.pallas import tpu as pltpu


def _round_up(x, m):
    return ((x + m - 1) // m) * m


def _vmem_capacity_bytes():
    try:
        cap = int(pltpu.get_tpu_info().vmem_capacity_bytes)
        if cap > 0:
            return cap
    except Exception:
        pass
    return 64 * 1024 * 1024          # conservative (v7x per-TensorCore VMEM)


# ----------------------------------------------------------------------------
# Conv path: im2col-free strided 3x3 conv as 9 MXU dot accumulations.
# ----------------------------------------------------------------------------
def _conv_plan(N, C, Cout, Ho, Wo, vmem_budget, hs_cap=None):
    """Pick channel tiles and the output-row strip height from the VMEM budget."""
    # Cin: keep un-tiled (K grid = 1) whenever it fits so activations are
    # streamed exactly once; pad tiny channel counts to one lane group.
    if C <= 768:
        cin_p = _round_up(C, 128) if C < 128 else _round_up(C, 8)
        tk = cin_p
    else:
        cin_p = _round_up(C, 256)
        tk = 512 if cin_p % 512 == 0 else 256
    # Cout: maximise tn (ideally tn == Cout, J = 1) before anything else.
    if Cout <= 1024:
        cout_p = _round_up(Cout, 128) if Cout < 128 else _round_up(Cout, 8)
        tn = cout_p
    else:
        cout_p = _round_up(Cout, 128)
        tn = 512 if cout_p % 512 == 0 else (256 if cout_p % 256 == 0 else 128)

    w1 = Wo + 1

    def footprint(hs):
        lb = (hs + 2) * w1
        return (2 * 4 * lb * tk * 2          # parity-plane slab, bf16, 2 bufs
                + 2 * 9 * tk * tn * 2        # weight taps, bf16, 2 bufs
                + 2 * tn * 4                 # bias
                + 2 * hs * w1 * tn * 4)      # resident f32 output block

    hs = Ho if hs_cap is None else max(1, min(int(hs_cap), Ho))
    while hs > 1 and footprint(hs) > vmem_budget:
        hs = max(1, (hs + 1) // 2)
    n_strips = -(-Ho // hs)
    # v7x has 2 TensorCores: make sure there are >= 2 parallel grid units.
    if N * (cout_p // tn) * n_strips < 2 and Ho >= 2:
        hs = -(-Ho // 2)
        n_strips = -(-Ho // hs)
    return cin_p, tk, cout_p, tn, hs, n_strips, footprint(hs)


def _make_conv_kernel(w1, lb, s_out):
    """planes_ref: (1, 1, 4*lb, tk) bf16 — plane p starts at flat row p*lb.
    w_ref: (9, tk, tn) bf16.  b_ref: (1, tn) f32.
    o_ref: (1, 1, s_out, tn) f32 — resident across the Cin reduction and used
    directly as the accumulator (no scratch)."""
    def kernel(planes_ref, w_ref, b_ref, o_ref):
        k = pl.program_id(3)

        @pl.when(k == 0)
        def _init():                              # bias-initialised accumulator
            o_ref[0, 0] = jnp.broadcast_to(b_ref[...], o_ref.shape[2:])

        acc = o_ref[0, 0]
        for kh in range(3):
            for kw in range(3):
                p = (kh % 2) * 2 + (kw % 2)       # parity plane
                start = p * lb + (kh // 2) * w1 + (kw // 2)
                # Contiguous sublane row-offset slice — no strided window copy.
                a = planes_ref[0, 0, pl.ds(start, s_out), :]
                acc = acc + jnp.dot(a, w_ref[kh * 3 + kw],
                                    preferred_element_type=jnp.float32)
        o_ref[0, 0] = acc

    return kernel


@functools.partial(jax.jit, static_argnames=("compute_dtype", "hs_cap"))
def _downsample_conv(x, w, b, *, compute_dtype=jnp.bfloat16, hs_cap=None):
    N, C, H, W = x.shape
    Cout = w.shape[0]
    Ho = (H - 1) // 2 + 1                         # (H + 2 - 3)//2 + 1
    Wo = (W - 1) // 2 + 1
    W1 = Wo + 1

    vmem_cap = _vmem_capacity_bytes()
    cin_p, tk, cout_p, tn, hs, n_strips, fp = _conv_plan(
        N, C, Cout, Ho, Wo, int(vmem_cap * 0.7), hs_cap)
    Ho_p = n_strips * hs
    Hplane = Ho_p + 2                             # plane rows incl. halo/pad
    Lb = (hs + 2) * W1                            # flat rows per plane strip
    S_out = hs * W1                               # accumulator rows per strip

    # --- wrapper layout: bf16 cast first, then pad + one space-to-depth
    # transpose (strip axis folded in); XLA fuses this into ~one HBM pass. ---
    xb = x.astype(compute_dtype)
    Hp, Wp = 2 * Hplane, 2 * W1
    xpad = jnp.pad(xb, ((0, 0), (0, 0), (1, Hp - H - 1), (1, Wp - W - 1)))
    xr = xpad.reshape(N, C, Hplane, 2, W1, 2)
    if n_strips == 1:
        xg = xr.reshape(N, C, 1, Hplane, 2, W1, 2)
    else:                                         # overlapping row-strips (halo=2)
        row_idx = (jnp.arange(n_strips)[:, None] * hs
                   + jnp.arange(hs + 2)[None, :])
        xg = xr[:, :, row_idx]                    # (N, C, S, hs+2, 2, W1, 2)
    planes = jnp.transpose(xg, (0, 2, 4, 6, 3, 5, 1))   # (N, S, 2, 2, hs+2, W1, C)
    planes = planes.reshape(N, n_strips, 4 * Lb, C)
    if cin_p != C:
        planes = jnp.pad(planes, ((0, 0), (0, 0), (0, 0), (0, cin_p - C)))

    # (Cout, Cin, 3, 3) -> (9, cin_p, cout_p): tap-major, Cout on lanes.
    w_taps = jnp.transpose(w, (2, 3, 1, 0)).reshape(9, C, Cout)
    w_taps = jnp.pad(w_taps, ((0, 0), (0, cin_p - C), (0, cout_p - Cout)))
    w_taps = w_taps.astype(compute_dtype)
    b_row = jnp.pad(b, (0, cout_p - Cout)).reshape(1, cout_p).astype(jnp.float32)

    grid = (N, n_strips, cout_p // tn, cin_p // tk)

    flops = 2 * N * Ho_p * W1 * 9 * cin_p * cout_p
    bytes_accessed = (
        N * n_strips * (cout_p // tn) * 4 * Lb * cin_p * 2      # activations
        + N * n_strips * 9 * cin_p * cout_p * 2                 # weights
        + N * n_strips * S_out * cout_p * 4)                    # output

    out = pl.pallas_call(
        _make_conv_kernel(W1, Lb, S_out),
        out_shape=jax.ShapeDtypeStruct((N, n_strips, S_out, cout_p),
                                       jnp.float32),
        grid_spec=pltpu.PrefetchScalarGridSpec(
            num_scalar_prefetch=0,
            grid=grid,
            in_specs=[
                pl.BlockSpec((1, 1, 4 * Lb, tk),
                             lambda n, s, j, k: (n, s, 0, k)),
                pl.BlockSpec((9, tk, tn), lambda n, s, j, k: (0, k, j)),
                pl.BlockSpec((1, tn), lambda n, s, j, k: (0, j)),
            ],
            out_specs=pl.BlockSpec((1, 1, S_out, tn),
                                   lambda n, s, j, k: (n, s, 0, j)),
        ),
        compiler_params=pltpu.CompilerParams(
            dimension_semantics=("parallel", "parallel", "parallel",
                                 "arbitrary"),
            vmem_limit_bytes=int(min(vmem_cap, max(32 << 20, fp + (16 << 20)))),
        ),
        cost_estimate=pl.CostEstimate(flops=flops, transcendentals=0,
                                      bytes_accessed=bytes_accessed),
    )(planes, w_taps, b_row)

    # Drop junk column / padded rows / padded channels; back to NCHW.
    out = out.reshape(N, Ho_p, W1, cout_p)[:, :Ho, :Wo, :Cout]
    return jnp.transpose(out, (0, 3, 1, 2)).astype(x.dtype)


# ----------------------------------------------------------------------------
# Pool path: AvgPool2d(2, 2) with the 2x2 gather folded into the kernel.
# ----------------------------------------------------------------------------
def _make_pool_kernel(w_cols):
    def kernel(x_ref, sel_ref, o_ref):
        # H-pair sum: two contiguous lane-halves of the free (rows, 2W) view.
        a = x_ref[:, :w_cols] + x_ref[:, w_cols:]
        # W-pair sum + 0.25 scale: 2-hot selector matmul at full f32 precision
        # (MXU is idle in this memory-bound kernel).
        o_ref[...] = jnp.dot(a, sel_ref[...],
                             precision=jax.lax.Precision.HIGHEST,
                             preferred_element_type=jnp.float32)
    return kernel


def _pick_row_tile(rows, row_bytes, target_bytes=4 << 20):
    t = max(8, min(rows, target_bytes // max(1, row_bytes)))
    t -= t % 8
    while t >= 8:
        if rows % t == 0:
            return t
        t -= 8
    return rows


@jax.jit
def _downsample_pool(x):
    N, C, H, W = x.shape
    Ho, Wo = H // 2, W // 2
    if H != 2 * Ho or W != 2 * Wo:                # AvgPool2d floor semantics
        x = x[:, :, :2 * Ho, :2 * Wo]
    Wfull = 2 * Wo
    rows = N * C * Ho
    # Free reshape: each row = [image row 2i | image row 2i+1], length 2*Wfull.
    xr = x.reshape(rows, 2 * Wfull).astype(jnp.float32)
    # 2-hot column-pair selector with the 1/4 scale folded in.
    sel = jnp.repeat(jnp.eye(Wo, dtype=jnp.float32), 2, axis=0) * 0.25

    tr = _pick_row_tile(rows, 2 * Wfull * 4)
    out = pl.pallas_call(
        _make_pool_kernel(Wfull),
        out_shape=jax.ShapeDtypeStruct((rows, Wo), jnp.float32),
        grid_spec=pltpu.PrefetchScalarGridSpec(
            num_scalar_prefetch=0,
            grid=(rows // tr,),
            in_specs=[pl.BlockSpec((tr, 2 * Wfull), lambda i: (i, 0)),
                      pl.BlockSpec((Wfull, Wo), lambda i: (0, 0))],
            out_specs=pl.BlockSpec((tr, Wo), lambda i: (i, 0)),
        ),
        compiler_params=pltpu.CompilerParams(
            dimension_semantics=("parallel",)),
    )(xr, sel)
    return out.reshape(N, C, Ho, Wo).astype(x.dtype)


# ----------------------------------------------------------------------------
# Downsample forward (matches the PyTorch module).
# ----------------------------------------------------------------------------
def downsample(x, params=None, use_conv=True, compute_dtype=jnp.bfloat16):
    if use_conv:
        return _downsample_conv(x, params["w"], params["b"],
                                compute_dtype=compute_dtype)
    return _downsample_pool(x)


# ----------------------------------------------------------------------------
# Deterministic parameter init (matches nn.Conv2d default init scheme).
# ----------------------------------------------------------------------------
def init_params(key, channels):
    fan_in = channels * 3 * 3
    bound = 1.0 / math.sqrt(fan_in)
    kw, kb = jax.random.split(key)
    w = jax.random.uniform(
        kw, (channels, channels, 3, 3), jnp.float32, -bound, bound)
    b = jax.random.uniform(kb, (channels,), jnp.float32, -bound, bound)
    return {"w": w, "b": b}


if __name__ == "__main__":
    key = jax.random.PRNGKey(0)
    k_x, k_p = jax.random.split(key)

    N, C, H, W = 2, 4, 16, 16
    x = jax.random.normal(k_x, (N, C, H, W), dtype=jnp.float32)
    params = init_params(k_p, C)

    def conv_ref(x_, w_, b_):
        return jax.lax.conv_general_dilated(
            x_, w_, window_strides=(2, 2), padding=((1, 1), (1, 1)),
            dimension_numbers=("NCHW", "OIHW", "NCHW"),
        ) + b_[None, :, None, None]

    # --- conv path (use_conv=True): Conv2d(C, C, 3, stride=2, padding=1) ---
    y_conv = jax.block_until_ready(downsample(x, params, use_conv=True))
    assert y_conv.shape == (N, C, H // 2, W // 2)
    # Tight check vs. a reference with the same bf16 operand rounding
    # (both accumulate in f32), plus a loose check vs. the exact f32 conv.
    xb = x.astype(jnp.bfloat16).astype(jnp.float32)
    wb = params["w"].astype(jnp.bfloat16).astype(jnp.float32)
    y_ref_bf16 = conv_ref(xb, wb, params["b"])
    err = float(jnp.max(jnp.abs(y_conv - y_ref_bf16)))
    assert jnp.allclose(y_conv, y_ref_bf16, atol=1e-4, rtol=1e-4), err
    y_ref_f32 = conv_ref(x, params["w"], params["b"])
    assert jnp.allclose(y_conv, y_ref_f32, atol=5e-2, rtol=5e-2)

    # --- conv path with a forced multi-strip (spatially tiled) schedule -----
    y_strip = jax.block_until_ready(
        _downsample_conv(x, params["w"], params["b"], hs_cap=3))
    err = float(jnp.max(jnp.abs(y_strip - y_ref_bf16)))
    assert jnp.allclose(y_strip, y_ref_bf16, atol=1e-4, rtol=1e-4), err

    # --- pool path (use_conv=False): AvgPool2d(2, 2) ------------------------
    y_pool = jax.block_until_ready(downsample(x, params, use_conv=False))
    assert y_pool.shape == (N, C, H // 2, W // 2)
    y_pool_ref = 0.25 * (x[:, :, 0::2, 0::2] + x[:, :, 1::2, 0::2]
                         + x[:, :, 0::2, 1::2] + x[:, :, 1::2, 1::2])
    err = float(jnp.max(jnp.abs(y_pool - y_pool_ref)))
    assert jnp.allclose(y_pool, y_pool_ref, atol=1e-4, rtol=1e-4), err

    # --- pool path with odd spatial dims (floor semantics) ------------------
    x_odd = jax.random.normal(jax.random.PRNGKey(1), (1, 4, 9, 7), jnp.float32)
    y_pool_odd = jax.block_until_ready(downsample(x_odd, None, use_conv=False))
    xo = x_odd[:, :, :8, :6]
    y_pool_odd_ref = 0.25 * (xo[:, :, 0::2, 0::2] + xo[:, :, 1::2, 0::2]
                             + xo[:, :, 0::2, 1::2] + xo[:, :, 1::2, 1::2])
    assert y_pool_odd.shape == (1, 4, 4, 3)
    assert jnp.allclose(y_pool_odd, y_pool_odd_ref, atol=1e-4, rtol=1e-4)

    print("KERNEL_OK")
</pallas_src>

<mosaic_0001>
module attributes {stable_mosaic.version = 11 : i64} {
  func.func @kernel(%arg0: i32, %arg1: i32, %arg2: i32, %arg3: i32, %arg4: memref<1x1x360x128xbf16, #tpu.memory_space<vmem>>, %arg5: memref<9x128x128xbf16, #tpu.memory_space<vmem>>, %arg6: memref<1x128xf32, #tpu.memory_space<vmem>>, %arg7: memref<1x1x72x128xf32, #tpu.memory_space<vmem>>) attributes {dimension_semantics = [#tpu.dimension_semantics<parallel>, #tpu.dimension_semantics<parallel>, #tpu.dimension_semantics<parallel>, #tpu.dimension_semantics<arbitrary>], iteration_bounds = array<i64: 2, 1, 1, 1>, scalar_prefetch = 0 : i64, scratch_operands = 0 : i64, tpu.core_type = #tpu.core_type<tc>, window_params = [{transform_indices = @transform_0, window_bounds = array<i64: 1, 1, 360, 128>}, {transform_indices = @transform_1, window_bounds = array<i64: 9, 128, 128>}, {transform_indices = @transform_2, window_bounds = array<i64: 1, 128>}, {transform_indices = @transform_3, window_bounds = array<i64: 1, 1, 72, 128>}]} {
    %c0_i32 = arith.constant 0 : i32
    %0 = arith.cmpi eq, %arg3, %c0_i32 : i32
    %1 = arith.extui %0 : i1 to i32
    %c0_i32_0 = arith.constant 0 : i32
    %2 = arith.cmpi ne, %1, %c0_i32_0 : i32
    scf.if %2 {
      %c0_64 = arith.constant 0 : index
      %c0_65 = arith.constant 0 : index
      %62 = vector.load %arg6[%c0_64, %c0_65] : memref<1x128xf32, #tpu.memory_space<vmem>>, vector<1x128xf32>
      %63 = vector.shape_cast %62 : vector<1x128xf32> to vector<1x128xf32>
      %64 = vector.broadcast %63 : vector<1x128xf32> to vector<72x128xf32>
      %c0_66 = arith.constant 0 : index
      %c0_67 = arith.constant 0 : index
      %c0_68 = arith.constant 0 : index
      %c0_69 = arith.constant 0 : index
      %65 = vector.load %arg7[%c0_66, %c0_67, %c0_68, %c0_69] : memref<1x1x72x128xf32, #tpu.memory_space<vmem>>, vector<1x1x72x128xf32>
      %66 = vector.shape_cast %65 : vector<1x1x72x128xf32> to vector<72x128xf32>
      %67 = vector.shape_cast %64 : vector<72x128xf32> to vector<1x1x72x128xf32>
      tpu.vector_store %arg7[%c0_66, %c0_67, %c0_68, %c0_69], %67 {strides = array<i32>} : memref<1x1x72x128xf32, #tpu.memory_space<vmem>>, vector<1x1x72x128xf32>,
    } else {
    }
    %c0 = arith.constant 0 : index
    %c0_1 = arith.constant 0 : index
    %c0_2 = arith.constant 0 : index
    %c0_3 = arith.constant 0 : index
    %3 = vector.load %arg7[%c0, %c0_1, %c0_2, %c0_3] : memref<1x1x72x128xf32, #tpu.memory_space<vmem>>, vector<1x1x72x128xf32>
    %4 = vector.shape_cast %3 : vector<1x1x72x128xf32> to vector<72x128xf32>
    %c0_4 = arith.constant 0 : index
    %c0_5 = arith.constant 0 : index
    %c0_6 = arith.constant 0 : index
    %c0_7 = arith.constant 0 : index
    %5 = vector.load %arg4[%c0_4, %c0_5, %c0_6, %c0_7] : memref<1x1x360x128xbf16, #tpu.memory_space<vmem>>, vector<1x1x72x128xbf16>
    %6 = vector.shape_cast %5 : vector<1x1x72x128xbf16> to vector<72x128xbf16>
    %c0_8 = arith.constant 0 : index
    %c0_9 = arith.constant 0 : index
    %c0_10 = arith.constant 0 : index
    %7 = vector.load %arg5[%c0_8, %c0_9, %c0_10] : memref<9x128x128xbf16, #tpu.memory_space<vmem>>, vector<1x128x128xbf16>
    %8 = vector.shape_cast %7 : vector<1x128x128xbf16> to vector<128x128xbf16>
    %cst = arith.constant dense<0.000000e+00> : vector<72x128xf32>
    %9 = tpu.matmul %6, %8, %cst {dimension_numbers = #tpu.dot_dimension_numbers<[1], [0], [0], [1], [0, 0, 1, 1], [], []>} : vector<72x128xbf16>, vector<128x128xbf16>, vector<72x128xf32> -> vector<72x128xf32>
    %10 = arith.addf %4, %9 : vector<72x128xf32>
    %c0_11 = arith.constant 0 : index
    %c0_12 = arith.constant 0 : index
    %c90 = arith.constant 90 : index
    %c0_13 = arith.constant 0 : index
    %11 = vector.load %arg4[%c0_11, %c0_12, %c90, %c0_13] : memref<1x1x360x128xbf16, #tpu.memory_space<vmem>>, vector<1x1x72x128xbf16>
    %12 = vector.shape_cast %11 : vector<1x1x72x128xbf16> to vector<72x128xbf16>
    %c1 = arith.constant 1 : index
    %c0_14 = arith.constant 0 : index
    %c0_15 = arith.constant 0 : index
    %13 = vector.load %arg5[%c1, %c0_14, %c0_15] : memref<9x128x128xbf16, #tpu.memory_space<vmem>>, vector<1x128x128xbf16>
    %14 = vector.shape_cast %13 : vector<1x128x128xbf16> to vector<128x128xbf16>
    %cst_16 = arith.constant dense<0.000000e+00> : vector<72x128xf32>
    %15 = tpu.matmul %12, %14, %cst_16 {dimension_numbers = #tpu.dot_dimension_numbers<[1], [0], [0], [1], [0, 0, 1, 1], [], []>} : vector<72x128xbf16>, vector<128x128xbf16>, vector<72x128xf32> -> vector<72x128xf32>
    %16 = arith.addf %10, %15 : vector<72x128xf32>
    %c0_17 = arith.constant 0 : index
    %c0_18 = arith.constant 0 : index
    %c1_19 = arith.constant 1 : index
    %c0_20 = arith.constant 0 : index
    %17 = vector.load %arg4[%c0_17, %c0_18, %c1_19, %c0_20] : memref<1x1x360x128xbf16, #tpu.memory_space<vmem>>, vector<1x1x72x128xbf16>
    %18 = vector.shape_cast %17 : vector<1x1x72x128xbf16> to vector<72x128xbf16>
    %c2 = arith.constant 2 : index
    %c0_21 = arith.constant 0 : index
    %c0_22 = arith.constant 0 : index
    %19 = vector.load %arg5[%c2, %c0_21, %c0_22] : memref<9x128x128xbf16, #tpu.memory_space<vmem>>, vector<1x128x128xbf16>
    %20 = vector.shape_cast %19 : vector<1x128x128xbf16> to vector<128x128xbf16>
    %cst_23 = arith.constant dense<0.000000e+00> : vector<72x128xf32>
    %21 = tpu.matmul %18, %20, %cst_23 {dimension_numbers = #tpu.dot_dimension_numbers<[1], [0], [0], [1], [0, 0, 1, 1], [], []>} : vector<72x128xbf16>, vector<128x128xbf16>, vector<72x128xf32> -> vector<72x128xf32>
    %22 = arith.addf %16, %21 : vector<72x128xf32>
    %c0_24 = arith.constant 0 : index
    %c0_25 = arith.constant 0 : index
    %c180 = arith.constant 180 : index
    %c0_26 = arith.constant 0 : index
    %23 = vector.load %arg4[%c0_24, %c0_25, %c180, %c0_26] : memref<1x1x360x128xbf16, #tpu.memory_space<vmem>>, vector<1x1x72x128xbf16>
    %24 = vector.shape_cast %23 : vector<1x1x72x128xbf16> to vector<72x128xbf16>
    %c3 = arith.constant 3 : index
    %c0_27 = arith.constant 0 : index
    %c0_28 = arith.constant 0 : index
    %25 = vector.load %arg5[%c3, %c0_27, %c0_28] : memref<9x128x128xbf16, #tpu.memory_space<vmem>>, vector<1x128x128xbf16>
    %26 = vector.shape_cast %25 : vector<1x128x128xbf16> to vector<128x128xbf16>
    %cst_29 = arith.constant dense<0.000000e+00> : vector<72x128xf32>
    %27 = tpu.matmul %24, %26, %cst_29 {dimension_numbers = #tpu.dot_dimension_numbers<[1], [0], [0], [1], [0, 0, 1, 1], [], []>} : vector<72x128xbf16>, vector<128x128xbf16>, vector<72x128xf32> -> vector<72x128xf32>
    %28 = arith.addf %22, %27 : vector<72x128xf32>
    %c0_30 = arith.constant 0 : index
    %c0_31 = arith.constant 0 : index
    %c270 = arith.constant 270 : index
    %c0_32 = arith.constant 0 : index
    %29 = vector.load %arg4[%c0_30, %c0_31, %c270, %c0_32] : memref<1x1x360x128xbf16, #tpu.memory_space<vmem>>, vector<1x1x72x128xbf16>
    %30 = vector.shape_cast %29 : vector<1x1x72x128xbf16> to vector<72x128xbf16>
    %c4 = arith.constant 4 : index
    %c0_33 = arith.constant 0 : index
    %c0_34 = arith.constant 0 : index
    %31 = vector.load %arg5[%c4, %c0_33, %c0_34] : memref<9x128x128xbf16, #tpu.memory_space<vmem>>, vector<1x128x128xbf16>
    %32 = vector.shape_cast %31 : vector<1x128x128xbf16> to vector<128x128xbf16>
    %cst_35 = arith.constant dense<0.000000e+00> : vector<72x128xf32>
    %33 = tpu.matmul %30, %32, %cst_35 {dimension_numbers = #tpu.dot_dimension_numbers<[1], [0], [0], [1], [0, 0, 1, 1], [], []>} : vector<72x128xbf16>, vector<128x128xbf16>, vector<72x128xf32> -> vector<72x128xf32>
    %34 = arith.addf %28, %33 : vector<72x128xf32>
    %c0_36 = arith.constant 0 : index
    %c0_37 = arith.constant 0 : index
    %c181 = arith.constant 181 : index
    %c0_38 = arith.constant 0 : index
    %35 = vector.load %arg4[%c0_36, %c0_37, %c181, %c0_38] : memref<1x1x360x128xbf16, #tpu.memory_space<vmem>>, vector<1x1x72x128xbf16>
    %36 = vector.shape_cast %35 : vector<1x1x72x128xbf16> to vector<72x128xbf16>
    %c5 = arith.constant 5 : index
    %c0_39 = arith.constant 0 : index
    %c0_40 = arith.constant 0 : index
    %37 = vector.load %arg5[%c5, %c0_39, %c0_40] : memref<9x128x128xbf16, #tpu.memory_space<vmem>>, vector<1x128x128xbf16>
    %38 = vector.shape_cast %37 : vector<1x128x128xbf16> to vector<128x128xbf16>
    %cst_41 = arith.constant dense<0.000000e+00> : vector<72x128xf32>
    %39 = tpu.matmul %36, %38, %cst_41 {dimension_numbers = #tpu.dot_dimension_numbers<[1], [0], [0], [1], [0, 0, 1, 1], [], []>} : vector<72x128xbf16>, vector<128x128xbf16>, vector<72x128xf32> -> vector<72x128xf32>
    %40 = arith.addf %34, %39 : vector<72x128xf32>
    %c0_42 = arith.constant 0 : index
    %c0_43 = arith.constant 0 : index
    %c9 = arith.constant 9 : index
    %c0_44 = arith.constant 0 : index
    %41 = vector.load %arg4[%c0_42, %c0_43, %c9, %c0_44] : memref<1x1x360x128xbf16, #tpu.memory_space<vmem>>, vector<1x1x72x128xbf16>
    %42 = vector.shape_cast %41 : vector<1x1x72x128xbf16> to vector<72x128xbf16>
    %c6 = arith.constant 6 : index
    %c0_45 = arith.constant 0 : index
    %c0_46 = arith.constant 0 : index
    %43 = vector.load %arg5[%c6, %c0_45, %c0_46] : memref<9x128x128xbf16, #tpu.memory_space<vmem>>, vector<1x128x128xbf16>
    %44 = vector.shape_cast %43 : vector<1x128x128xbf16> to vector<128x128xbf16>
    %cst_47 = arith.constant dense<0.000000e+00> : vector<72x128xf32>
    %45 = tpu.matmul %42, %44, %cst_47 {dimension_numbers = #tpu.dot_dimension_numbers<[1], [0], [0], [1], [0, 0, 1, 1], [], []>} : vector<72x128xbf16>, vector<128x128xbf16>, vector<72x128xf32> -> vector<72x128xf32>
    %46 = arith.addf %40, %45 : vector<72x128xf32>
    %c0_48 = arith.constant 0 : index
    %c0_49 = arith.constant 0 : index
    %c99 = arith.constant 99 : index
    %c0_50 = arith.constant 0 : index
    %47 = vector.load %arg4[%c0_48, %c0_49, %c99, %c0_50] : memref<1x1x360x128xbf16, #tpu.memory_space<vmem>>, vector<1x1x72x128xbf16>
    %48 = vector.shape_cast %47 : vector<1x1x72x128xbf16> to vector<72x128xbf16>
    %c7 = arith.constant 7 : index
    %c0_51 = arith.constant 0 : index
    %c0_52 = arith.constant 0 : index
    %49 = vector.load %arg5[%c7, %c0_51, %c0_52] : memref<9x128x128xbf16, #tpu.memory_space<vmem>>, vector<1x128x128xbf16>
    %50 = vector.shape_cast %49 : vector<1x128x128xbf16> to vector<128x128xbf16>
    %cst_53 = arith.constant dense<0.000000e+00> : vector<72x128xf32>
    %51 = tpu.matmul %48, %50, %cst_53 {dimension_numbers = #tpu.dot_dimension_numbers<[1], [0], [0], [1], [0, 0, 1, 1], [], []>} : vector<72x128xbf16>, vector<128x128xbf16>, vector<72x128xf32> -> vector<72x128xf32>
    %52 = arith.addf %46, %51 : vector<72x128xf32>
    %c0_54 = arith.constant 0 : index
    %c0_55 = arith.constant 0 : index
    %c10 = arith.constant 10 : index
    %c0_56 = arith.constant 0 : index
    %53 = vector.load %arg4[%c0_54, %c0_55, %c10, %c0_56] : memref<1x1x360x128xbf16, #tpu.memory_space<vmem>>, vector<1x1x72x128xbf16>
    %54 = vector.shape_cast %53 : vector<1x1x72x128xbf16> to vector<72x128xbf16>
    %c8 = arith.constant 8 : index
    %c0_57 = arith.constant 0 : index
    %c0_58 = arith.constant 0 : index
    %55 = vector.load %arg5[%c8, %c0_57, %c0_58] : memref<9x128x128xbf16, #tpu.memory_space<vmem>>, vector<1x128x128xbf16>
    %56 = vector.shape_cast %55 : vector<1x128x128xbf16> to vector<128x128xbf16>
    %cst_59 = arith.constant dense<0.000000e+00> : vector<72x128xf32>
    %57 = tpu.matmul %54, %56, %cst_59 {dimension_numbers = #tpu.dot_dimension_numbers<[1], [0], [0], [1], [0, 0, 1, 1], [], []>} : vector<72x128xbf16>, vector<128x128xbf16>, vector<72x128xf32> -> vector<72x128xf32>
    %58 = arith.addf %52, %57 : vector<72x128xf32>
    %c0_60 = arith.constant 0 : index
    %c0_61 = arith.constant 0 : index
    %c0_62 = arith.constant 0 : index
    %c0_63 = arith.constant 0 : index
    %59 = vector.load %arg7[%c0_60, %c0_61, %c0_62, %c0_63] : memref<1x1x72x128xf32, #tpu.memory_space<vmem>>, vector<1x1x72x128xf32>
    %60 = vector.shape_cast %59 : vector<1x1x72x128xf32> to vector<72x128xf32>
    %61 = vector.shape_cast %58 : vector<72x128xf32> to vector<1x1x72x128xf32>
    tpu.vector_store %arg7[%c0_60, %c0_61, %c0_62, %c0_63], %61 {strides = array<i32>} : memref<1x1x72x128xf32, #tpu.memory_space<vmem>>, vector<1x1x72x128xf32>,
    return
  }
  func.func @transform_0(%arg0: i32, %arg1: i32, %arg2: i32, %arg3: i32) -> (i32, i32, i32, i32) {
    %c0_i32 = arith.constant 0 : i32
    %c0_i32_0 = arith.constant 0 : i32
    return %arg0, %arg1, %c0_i32, %arg3 : i32, i32, i32, i32
  }
  func.func @transform_1(%arg0: i32, %arg1: i32, %arg2: i32, %arg3: i32) -> (i32, i32, i32) {
    %c0_i32 = arith.constant 0 : i32
    %c0_i32_0 = arith.constant 0 : i32
    return %c0_i32, %arg3, %arg2 : i32, i32, i32
  }
  func.func @transform_2(%arg0: i32, %arg1: i32, %arg2: i32, %arg3: i32) -> (i32, i32) {
    %c0_i32 = arith.constant 0 : i32
    %c0_i32_0 = arith.constant 0 : i32
    return %c0_i32, %arg2 : i32, i32
  }
  func.func @transform_3(%arg0: i32, %arg1: i32, %arg2: i32, %arg3: i32) -> (i32, i32, i32, i32) {
    %c0_i32 = arith.constant 0 : i32
    %c0_i32_0 = arith.constant 0 : i32
    return %arg0, %arg1, %c0_i32, %arg2 : i32, i32, i32, i32
  }
}

</mosaic_0001>

<bundles_post_ra>
// kernel: _downsample_conv.1
= control target key start
LH: loop header
LB: loop body
LE: loop exit
PB: predicated region body
PF: predicated region fallthrough
CT: control target
= control target key end

     0   :  { %s3326_s12 = smov 0   ;;  %s3328_s13 = smov 0   ;;  %s3919_s0 = inlined_call_operand.vmem [shape: bf16[2,1,360,128], index: 0, kind: input, shape index: {}]   ;;  %s3920_s1 = inlined_call_operand.vmem [shape: bf16[9,128,128], index: 1, kind: input, shape index: {}]   ;;  %s3921_s2 = inlined_call_operand.vmem [shape: f32[1,128], index: 2, kind: input, shape index: {}]   ;;  %s3922_s3 = inlined_call_operand.vmem [shape: f32[2,1,72,128], index: 3, kind: output, shape index: {}]  }
   0x1   :  { %s3330_s14 = smov 0  }
   0x2 LB: > { %s39_s15 = sadd.s32 1, %s3298_s13  ;;  %p2290_p0 = scmp.ge.s32.totalorder %s3302_s14, 1  ;;  %s3302_s14 = sphi %s3330_s14, %s13_s14   ;;  %s3298_s13 = sphi %s3328_s13, %s3924_s13   ;;  %s3294_s12 = sphi %s3326_s12, %s3923_s12  }
   0x3   : > { %p41_p1 = scmp.ge.s32.totalorder %s39_s15, 2  ;;  %p202_p2 = scmp.lt.s32.totalorder %s3302_s14, 3 }
   0x5   : > { %s3926_s15 = smov (%p41_p1, %s39_s15), 0  ;;  %p203_p3 = pnand %p2290_p0, %p202_p2 }
   0x6   : > { %v3171_v0 = vld [vmem:[%s3920_s1] sm:$0xff] (!%p203_p3)   ;;  %v3304_v1 = vmov (!%p203_p3), 0.0   ;;  %v3173_v3 = vld [vmem:[%s3920_s1 + $0x8] sm:$0xff] (!%p203_p3)   ;;  %vm3305_vm0 = vmmov (!%p203_p3), 0   ;;  %p251_p4 = scmp.lt.s32.totalorder (!%p203_p3), %s3294_s12, 1  ;;  %v3175_v5 = vld [vmem:[%s3920_s1 + $0x10] sm:$0xff] (!%p203_p3)  }
   0x7   : > { %206 = sbr.rel (%p203_p3) target bundleno = 433 (0x1b1), region = 32  ;;  %2650 = vmatprep.subr.bf16.mxu1 (!%p203_p3), %v3304_v1  ;;  %2794 = vmatprep.subr.bf16.mxu0 (!%p203_p3), %v3304_v1  ;;  %v3172_v2 = vld [vmem:[%s3920_s1 + $0x100] sm:$0xff] (!%p203_p3)   ;;  %v3174_v4 = vld [vmem:[%s3920_s1 + $0x108] sm:$0xff] (!%p203_p3)   ;;  %v3176_v6 = vld [vmem:[%s3920_s1 + $0x110] sm:$0xff] (!%p203_p3)   ;;  %vm1169_vm1 = vcmask (!%p203_p3), 1044480   ;;  %vm551_vm2 = vcmask (!%p203_p3), 1046528  }
   0x8   : > { %2651 = vmatpush3.bf16.msra.mxu1 (!%p203_p3), %v3171_v0  ;;  %2666 = vmatprep.mubr.msk.bf16.mxu1 (!%p203_p3), %vm3305_vm0, %v3304_v1  ;;  %v3177_v7 = vld [vmem:[%s3920_s1 + $0x18] sm:$0xff] (!%p203_p3)   ;;  %v3179_v9 = vld [vmem:[%s3920_s1 + $0x20] sm:$0xff] (!%p203_p3)   ;;  %v3181_v11 = vld [vmem:[%s3920_s1 + $0x28] sm:$0xff] (!%p203_p3)   ;;  %vm973_vm3 = vcmask (!%p203_p3), 1045504   ;;  %vm1334_vm4 = vsmask.f32 (!%p203_p3), 5376 }
   0x9   : > { %2795 = vmatpush3.bf16.msra.mxu0 (!%p203_p3), %v3172_v2  ;;  %2652 = vmatprep.subr.bf16.mxu1 (!%p203_p3), %v3304_v1  ;;  %v3178_v8 = vld [vmem:[%s3920_s1 + $0x118] sm:$0xff] (!%p203_p3)   ;;  %v3180_v10 = vld [vmem:[%s3920_s1 + $0x120] sm:$0xff] (!%p203_p3)   ;;  %v3182_v12 = vld [vmem:[%s3920_s1 + $0x128] sm:$0xff] (!%p203_p3)   ;;  %vm747_vm5 = vsmask.f32 (!%p203_p3), 7424 }
   0xa   : > { %2796 = vmatprep.subr.bf16.mxu0 (!%p203_p3), %v3304_v1  ;;  %2810 = vmatprep.mubr.msk.bf16.mxu0 (!%p203_p3), %vm3305_vm0, %v3304_v1  ;;  %v3183_v13 = vld [vmem:[%s3920_s1 + $0x30] sm:$0xff] (!%p203_p3)   ;;  %v3185_v17 = vld [vmem:[%s3920_s1 + $0x38] sm:$0xff] (!%p203_p3)   ;;  %v3190_v22 = vld [vmem:[%s3920_s1 + $0x140] sm:$0xff] (!%p203_p3)   ;;  %vm1790_vm6 = vsmask.f32 (!%p203_p3), 6400 }
   0xb   : > { %v3184_v14 = vld [vmem:[%s3920_s1 + $0x130] sm:$0xff] (!%p203_p3)   ;;  %v3186_v18 = vld [vmem:[%s3920_s1 + $0x138] sm:$0xff] (!%p203_p3)   ;;  %v3194_v25 = vld [vmem:[%s3920_s1 + $0x40] sm:$0xff] (!%p203_p3)  }
   0xc   : > { %2653 = vmatpush3.bf16.msra.mxu1 (!%p203_p3), %v3173_v3  ;;  %v3191_v26 = vld [vmem:[%s3920_s1 + $0x148] sm:$0xff] (!%p203_p3)   ;;  %v3195_v30 = vld [vmem:[%s3920_s1 + $0x150] sm:$0xff] (!%p203_p3)   ;;  %v3199_v35 = vld [vmem:[%s3920_s1 + $0x158] sm:$0xff] (!%p203_p3)  }
   0xd   : > { %2797 = vmatpush3.bf16.msra.mxu0 (!%p203_p3), %v3174_v4  ;;  %2654 = vmatprep.subr.bf16.mxu1 (!%p203_p3), %v3304_v1  ;;  %v3196_v28 = vld [vmem:[%s3920_s1 + $0x48] sm:$0xff] (!%p203_p3)   ;;  %v3200_v33 = vld [vmem:[%s3920_s1 + $0x50] sm:$0xff] (!%p203_p3)   ;;  %v3201_v36 = vld [vmem:[%s3920_s1 + $0x58] sm:$0xff] (!%p203_p3)  }
   0xe   : > { %s3928_s12 = smov (!%p251_p4, %s3294_s12), 1  ;;  %2798 = vmatprep.subr.bf16.mxu0 %v3304_v1  ;;  %v3202_v40 = vld [vmem:[%s3920_s1 + $0x160] sm:$0xff]   ;;  %v3206_v43 = vld [vmem:[%s3920_s1 + $0x168] sm:$0xff]   ;;  %v3208_v47 = vld [vmem:[%s3920_s1 + $0x170] sm:$0xff]  }
   0xf   : > { %s3143_s5 = smul.u32 180, %s3928_s12  ;;  %v3205_v41 = vld [vmem:[%s3920_s1 + $0x60] sm:$0xff]   ;;  %v3207_v45 = vld [vmem:[%s3920_s1 + $0x68] sm:$0xff]   ;;  %v3210_v50 = vld [vmem:[%s3920_s1 + $0x70] sm:$0xff]  }
  0x10   : > { %2655 = vmatpush3.bf16.msra.mxu1 %v3175_v5  ;;  %v3211_v53 = vld [vmem:[%s3920_s1 + $0x178] sm:$0xff]  }
  0x11   : > { %2799 = vmatpush3.bf16.msra.mxu0 %v3176_v6  ;;  %2656 = vmatprep.subr.bf16.mxu1 %v3304_v1  ;;  %s3397_s16 = scalar_lea.vmem %s3919_s0, %s3143_s5  ;;  %v3212_v57 = vld [vmem:[%s3920_s1 + $0x78] sm:$0xff]   ;;  %s3144_s5 = smul.u32 72, %s3928_s12 }
  0x12   : > { %2800 = vmatprep.subr.bf16.mxu0 %v3304_v1  ;;  %v3188_v15 = vld [vmem:[%s3397_s16 + $0x84] sm:$0xf8]   ;;  %v3189_v16 = vld [vmem:[%s3397_s16 + $0x8c] sm:$0xff]   ;;  %v3193_v24 = vld [vmem:[%s3397_s16 + $0x94] sm:$0xff]  }
  0x13   : > { %v1170_v19 = vrot.slane %v3188_v15, 3  ;;  %v1171_v20 = vrot.slane %v3189_v16, 3  ;;  %v3187_v21 = vld [vmem:[%s3397_s16] sm:$0xff]   ;;  %v1173_v27 = vrot.slane %v3193_v24, 3  ;;  %v3192_v29 = vld [vmem:[%s3397_s16 + $0x8] sm:$0xff]   ;;  %v3197_v37 = vld [vmem:[%s3397_s16 + $0x10] sm:$0xff]   ;;  %s3897_s8 = scalar_lea.vmem %s3922_s3, %s3144_s5 }
  0x14   : > { %2657 = vmatpush3.bf16.msra.mxu1 %v3177_v7  ;;  %v3198_v32 = vld [vmem:[%s3397_s16 + $0x9c] sm:$0xff]   ;;  %v3204_v38 = vld [vmem:[%s3397_s16 + $0xa4] sm:$0x7f]   ;;  %v3213_v58 = vld [vmem:[%s3397_s16 + $0x2c] sm:$0xfe]  }
  0x15   : > { %2801 = vmatpush3.bf16.msra.mxu0 %v3178_v8  ;;  %2658 = vmatprep.subr.bf16.mxu1 %v3304_v1  ;;  %v1172_v23 = vsel %vm1169_vm1, %v1170_v19, %v1171_v20  ;;  %v1174_v31 = vsel %vm1169_vm1, %v1171_v20, %v1173_v27  ;;  %v1175_v34 = vrot.slane %v3198_v32, 3  ;;  %v1177_v42 = vrot.slane %v3204_v38, 3  ;;  %v3203_v44 = vld [vmem:[%s3397_s16 + $0x18] sm:$0xff]   ;;  %v3216_v48 = vld [vmem:[%s3397_s16 + $0x60] sm:$0xff]   ;;  %v3220_v2 = vld [vmem:[%s3397_s16 + $0x68] sm:$0xff]  }
  0x16   : > { %2802 = vmatprep.subr.bf16.mxu0 %v3304_v1  ;;  %v3215_v46 = vld [vmem:[%s3397_s16 + $0x58] sm:$0xfc]   ;;  %v1344_v54 = vshrl.u32 %v3216_v48, 16  ;;  %v1347_v55 = vshll.u32 %v3216_v48, 16  ;;  %v3209_v56 = vld [vmem:[%s3397_s16 + $0x20] ss:$0 sps:$4 sm:$0xff]  }
  0x17   : > { %v1176_v39 = vsel %vm1169_vm1, %v1173_v27, %v1175_v34  ;;  %v1178_v49 = vsel %vm1169_vm1, %v1175_v34, %v1177_v42  ;;  %v1336_v51 = vshrl.u32 %v3215_v46, 16  ;;  %v1339_v52 = vshll.u32 %v3215_v46, 16  ;;  %v3214_v59 = vld [vmem:[%s3397_s16 + $0x34] sm:$0xff]  }
  0x18   : > { %2659 = vmatpush3.bf16.msra.mxu1 %v3179_v9  ;;  %v1346_v62 = vrot.slane %v1344_v54, 2  ;;  %v974_v63 = vrot.slane %v3215_v46, 2  ;;  %v1349_v0 = vrot.slane %v1347_v55, 3  ;;  %v552_v3 = vrot.slane %v3213_v58, 1  ;;  %v3227_v38 = vld [vmem:[%s3920_s1 + $0x90] sm:$0xff]  }
  0x19   : > { %2803 = vmatpush3.bf16.msra.mxu0 %v3180_v10  ;;  %2660 = vmatprep.subr.bf16.mxu1 %v3304_v1  ;;  %v1338_v60 = vrot.slane %v1336_v51, 2  ;;  %v1341_v61 = vrot.slane %v1339_v52, 3  ;;  %v975_v4 = vrot.slane %v3216_v48, 2  ;;  %v553_v5 = vrot.slane %v3214_v59, 1  ;;  %v3232_v51 = vld [vmem:[%s3920_s1 + $0xa0] sm:$0xff]   ;;  %v3235_v58 = vld [vmem:[%s3920_s1 + $0x1b0] sm:$0xff]  }
  0x1a   : > { %2804 = vmatprep.subr.bf16.mxu0 %v3304_v1  ;;  %v977_v7 = vrot.slane %v3220_v2, 2  ;;  %v1350_v9 = vor.u32 %v1349_v0, %v1346_v62  ;;  %v1353_v10 = vshrl.u32 %v3220_v2, 16  ;;  %v1513_v54 = vld [vmem:[%s3397_s16 + $0x4] sm:$0xf]  ;;  %v3240_v0 = vld [vmem:[%s3397_s16 + $0x8] sm:$0xff]  }
  0x1b   : > { %v3528_v6 = vsel %vm973_vm3, %v974_v63, %v975_v4  ;;  %v1342_v8 = vor.u32 %v1341_v61, %v1338_v60  ;;  %v554_v16 = vsel %vm551_vm2, %v552_v3, %v553_v5  ;;  %v3236_v60 = vld [vmem:[%s3920_s1 + $0xb0] sm:$0xff]   ;;  %v3239_v61 = vld [vmem:[%s3397_s16] sm:$0xff]  }
  0x1c   : > { %2661 = vmatpush3.bf16.msra.mxu1 %v3181_v11  ;;  %v1356_v11 = vshll.u32 %v3220_v2, 16  ;;  %v1355_v19 = vrot.slane %v1353_v10, 2  ;;  %v3638_v2 = vld [vmem:[%s3397_s16 + $0xc] sm:$0xff]   ;;  %v751_v3 = vshll.u32 %v3239_v61, 16 }
  0x1d   : > { %2805 = vmatpush3.bf16.msra.mxu0 %v3182_v12  ;;  %2662 = vmatprep.subr.bf16.mxu1 %v3304_v1  ;;  %v3533_v12 = vld [vmem:[%s3397_s16 + $0x70] sm:$0xff]   ;;  %v1573_v10 = vshll.u32 %v3638_v2, 16 }
  0x1e   : > { %2806 = vmatprep.subr.bf16.mxu0 %v3304_v1  ;;  %v979_v15 = vrot.slane %v3533_v12, 2  ;;  %v1358_v20 = vrot.slane %v1356_v11, 3  ;;  %v3654_v11 = vld [vmem:[%s3397_s16 + $0x14] sm:$0xff]  }
  0x20   : > { %2663 = vmatpush3.bf16.msra.mxu1 %v3183_v13  ;;  %v3536_v13 = vsel %vm973_vm3, %v975_v4, %v977_v7  ;;  %v1359_v27 = vor.u32 %v1358_v20, %v1355_v19  ;;  %v1991_v19 = vrot.slane %v3638_v2, 1 }
  0x21   : > { %2807 = vmatpush3.bf16.msra.mxu0 %v3184_v14  ;;  %2664 = vmatprep.subr.bf16.mxu1 %v3304_v1  ;;  %v3219_v14 = vld [vmem:[%s3397_s16 + $0x3c] sm:$0xff]  }
  0x22   : > { %2808 = vmatprep.subr.bf16.mxu0 %v3304_v1  ;;  %v555_v24 = vrot.slane %v3219_v14, 1  ;;  %v3657_v14 = vld [vmem:[%s3397_s16 + $0x1c] sm:$0xff]  }
  0x23   : > { %v1995_v20 = vrot.slane %v3657_v14, 1 }
  0x24   : > { %2665 = vmatpush3.bf16.msra.mxu1 %v3185_v17  ;;  %v1351_v17 = vsel %vm1334_vm4, %v1342_v8, %v1350_v9  ;;  %v556_v32 = vsel %vm551_vm2, %v553_v5, %v555_v24  ;;  %v3237_v5 = vld [vmem:[%s3920_s1 + $0x1b8] sm:$0xff]   ;;  %v749_v8 = vshrl.u32 %v3239_v61, 16  ;;  %v3731_v61 = vld [vmem:[%s3397_s16 + $0x20] sm:$0x1f]  }
  0x25   : > { %2809 = vmatpush3.bf16.msra.mxu0 %v3186_v18  ;;  %2686 = vmatprep.subr.bf16.mxu1 %v3304_v1  ;;  %v3217_v18 = vld [vmem:[%s3920_s1 + $0x180] sm:$0xff]  }
  0x26   : > { %2830 = vmatprep.subr.bf16.mxu0 %v3304_v1 }
  0x27   : > { %2667 = vmatmul.mubr.bf16.vlgmr.msra.gmra.mrb[0].mxu1 %v3187_v21  ;;  %v3548_v21 = vsel %vm973_vm3, %v977_v7, %v979_v15  ;;  %v3238_v7 = vld [vmem:[%s3920_s1 + $0xb8] sm:$0xff]  }
  0x28   : > { %2811 = vmatmul.mubr.bf16.vlgmr.msra.gmra.mrb[0].mxu0 %v1172_v23  ;;  %2670 = vmatprep.mubr.msk.bf16.mxu1 %vm3305_vm0, %v3304_v1  ;;  %v3218_v23 = vld [vmem:[%s3920_s1 + $0x188] sm:$0xff]  }
  0x29   : > { %2831 = vmatpush3.bf16.msra.mxu0 %v3190_v22  ;;  %2814 = vmatprep.mubr.msk.bf16.mxu0 %vm3305_vm0, %v3304_v1  ;;  %v3221_v22 = vld [vmem:[%s3920_s1 + $0x80] sm:$0xff]  }
  0x2a   : > { %2832 = vmatprep.subr.bf16.mxu0 %v3304_v1  ;;  %2687 = vmatpush3.bf16.msra.mxu1 %v3194_v25  ;;  %v1362_v25 = vshrl.u32 %v3533_v12, 16 }
  0x2b   : > { %2688 = vmatprep.subr.bf16.mxu1 %v3304_v1 }
  0x2d   : > { %2833 = vmatpush3.bf16.msra.mxu0 %v3191_v26  ;;  %v1365_v26 = vshll.u32 %v3533_v12, 16 }
  0x2e   : > { %2834 = vmatprep.subr.bf16.mxu0 %v3304_v1  ;;  %2689 = vmatpush3.bf16.msra.mxu1 %v3196_v28  ;;  %v3563_v28 = vld [vmem:[%s3397_s16 + $0x78] sm:$0xf] }
  0x2f   : > { %2671 = vmatmul.mubr.bf16.gmra.mrb[4].mxu1 %v3192_v29  ;;  %2690 = vmatprep.subr.bf16.mxu1 %v3304_v1  ;;  %v1313_v29 = vld [vmem:[%s3397_s16 + $0x7c] sm:$0x7] }
  0x30   : > { %2815 = vmatmul.mubr.bf16.gmra.mrb[4].mxu0 %v1174_v31  ;;  %2674 = vmatprep.mubr.msk.bf16.mxu1 %vm3305_vm0, %v3304_v1  ;;  %v3222_v31 = vld [vmem:[%s3920_s1 + $0x190] sm:$0xff]   ;;  %v2439_v34 = vcombine.low %v3563_v28, %v1313_v29 }
  0x31   : > { %2835 = vmatpush3.bf16.msra.mxu0 %v3195_v30  ;;  %2818 = vmatprep.mubr.msk.bf16.mxu0 %vm3305_vm0, %v3304_v1  ;;  %v3223_v30 = vld [vmem:[%s3920_s1 + $0x88] sm:$0xff]  }
  0x32   : > { %2836 = vmatprep.subr.bf16.mxu0 %v3304_v1  ;;  %2691 = vmatpush3.bf16.msra.mxu1 %v3200_v33  ;;  %v3224_v33 = vld [vmem:[%s3397_s16 + $0x44] sm:$0xff]  }
  0x33   : > { %2692 = vmatprep.subr.bf16.mxu1 %v3304_v1 }
  0x35   : > { %2837 = vmatpush3.bf16.msra.mxu0 %v3199_v35  ;;  %v1360_v35 = vsel %vm1334_vm4, %v1350_v9, %v1359_v27  ;;  %v756_v9 = vshll.u32 %v3240_v0, 16 }
  0x36   : > { %2838 = vmatprep.subr.bf16.mxu0 %v3304_v1  ;;  %2693 = vmatpush3.bf16.msra.mxu1 %v3201_v36  ;;  %v1364_v36 = vrot.slane %v1362_v25, 2 }
  0x37   : > { %2675 = vmatmul.mubr.bf16.gmra.mrb[8].mxu1 %v3197_v37  ;;  %2694 = vmatprep.subr.bf16.mxu1 %v3304_v1  ;;  %v1367_v37 = vrot.slane %v1365_v26, 3 }
  0x38   : > { %2819 = vmatmul.mubr.bf16.gmra.mrb[8].mxu0 %v1176_v39  ;;  %2678 = vmatprep.mubr.msk.bf16.mxu1 %vm3305_vm0, %v3304_v1  ;;  %v557_v39 = vrot.slane %v3224_v33, 1 }
  0x39   : > { %2839 = vmatpush3.bf16.msra.mxu0 %v3202_v40  ;;  %2822 = vmatprep.mubr.msk.bf16.mxu0 %vm3305_vm0, %v3304_v1  ;;  %v1371_v40 = vshrl.u32 %v2439_v34, 16 }
  0x3a   : > { %2695 = vmatpush3.bf16.msra.mxu1 %v3205_v41  ;;  %2840 = vmatprep.subr.bf16.mxu0 %v3304_v1  ;;  %v1374_v41 = vshll.u32 %v2439_v34, 16  ;;  %v558_v46 = vsel %vm551_vm2, %v555_v24, %v557_v39  ;;  %v3245_v24 = vld [vmem:[%s3397_s16 + $0x10] sm:$0xff]  }
  0x3b   : > { %2696 = vmatprep.subr.bf16.mxu1 %v3304_v1  ;;  %v1373_v48 = vrot.slane %v1371_v40, 2  ;;  %v764_v33 = vshll.u32 %v3245_v24, 16 }
  0x3d   : > { %2841 = vmatpush3.bf16.msra.mxu0 %v3206_v43  ;;  %v3226_v43 = vld [vmem:[%s3920_s1 + $0x198] sm:$0xff]  }
  0x3e   : > { %2697 = vmatpush3.bf16.msra.mxu1 %v3207_v45  ;;  %2842 = vmatprep.subr.bf16.mxu0 %v3304_v1  ;;  %v3596_v45 = vld [vmem:[%s3397_s16 + $0x4c] sm:$0x1f]  }
  0x3f   : > { %2679 = vmatmul.mubr.bf16.gmra.mrb[12].mxu1 %v3203_v44  ;;  %2698 = vmatprep.subr.bf16.mxu1 %v3304_v1  ;;  %v3228_v44 = vld [vmem:[%s3920_s1 + $0x98] sm:$0xff]   ;;  %v559_v52 = vrot.slane %v3596_v45, 1  ;;  %v766_v45 = vrot.slane %v764_v33, 1  ;;  %v3262_v33 = vld [vmem:[%s3920_s1 + $0xf0] sm:$0xff]  }
  0x40   : > { %2823 = vmatmul.mubr.bf16.gmra.mrb[12].mxu0 %v1178_v49  ;;  %2682 = vmatprep.mubr.msk.bf16.mxu1 %vm3305_vm0, %v3304_v1  ;;  %v1376_v49 = vrot.slane %v1374_v41, 3  ;;  %v3247_v41 = vld [vmem:[%s3920_s1 + $0xc0] sm:$0xff]  }
  0x41   : > { %2826 = vmatprep.mubr.msk.bf16.mxu0 %vm3305_vm0, %v3304_v1  ;;  %2843 = vmatpush3.bf16.msra.mxu0 %v3208_v47  ;;  %v3229_v47 = vld [vmem:[%s3920_s1 + $0x1a0] sm:$0xff]   ;;  %v560_v59 = vsel %vm551_vm2, %v557_v39, %v559_v52  ;;  %v1581_v39 = vshll.u32 %v3654_v11, 16 }
  0x42   : > { %2699 = vmatpush3.bf16.msra.mxu1 %v3210_v50  ;;  %2844 = vmatprep.subr.bf16.mxu0 %v3304_v1  ;;  %v1377_v55 = vor.u32 %v1376_v49, %v1373_v48  ;;  %v3249_v49 = vld [vmem:[%s3920_s1 + $0xc8] sm:$0xff]  }
  0x43   : > { %2700 = vmatprep.subr.bf16.mxu1 %v3304_v1 }
  0x45   : > { %2845 = vmatpush3.bf16.msra.mxu0 %v3211_v53  ;;  %v3233_v53 = vld [vmem:[%s3920_s1 + $0x1a8] sm:$0xff]  }
  0x46   : > { %2701 = vmatpush3.bf16.msra.mxu1 %v3212_v57  ;;  %2866 = vmatprep.subr.bf16.mxu0 %v3304_v1  ;;  %v3234_v57 = vld [vmem:[%s3920_s1 + $0xa8] sm:$0xff]  }
  0x47   : > { %2683 = vmatmul.mubr.bf16.gmra.mrb[16].mxu1 %v3209_v56  ;;  %2722 = vmatprep.subr.bf16.mxu1 %v3304_v1  ;;  %v3618_v56 = vld [vmem:[%s3397_s16 + $0x8] sm:$0xf] }
  0x48   : > { %2827 = vmatmul.mubr.bf16.gmra.mrb[16].mxu0 %v1177_v42  ;;  %2702 = vmatprep.mubr.msk.bf16.mxu1 %vm3305_vm0, %v3304_v1  ;;  %v1368_v42 = vor.u32 %v1367_v37, %v1364_v36  ;;  %v2464_v62 = vcombine.low %v1513_v54, %v3618_v56  ;;  %v3243_v37 = vld [vmem:[%s3920_s1 + $0x1c0] sm:$0xff]  }
  0x49   : > { %2846 = vmatprep.mubr.msk.bf16.mxu0 %vm3305_vm0, %v3304_v1 }
  0x4a   : > { %v1369_v50 = vsel %vm1334_vm4, %v1359_v27, %v1368_v42  ;;  %v1378_v63 = vsel %vm1334_vm4, %v1368_v42, %v1377_v55  ;;  %v1568_v4 = vshll.u32 %v2464_v62, 16 }
  0x4f   : > { %2703 = vmatmul.mubr.bf16.vlgmr.msra.gmra.mrb[0].mxu1 %v554_v16  ;;  %v753_v16 = vrot.slane %v751_v3, 1  ;;  %v3254_v3 = vld [vmem:[%s3920_s1 + $0xd8] sm:$0xff]  }
  0x50   : > { %2847 = vmatmul.mubr.bf16.vlgmr.msra.gmra.mrb[0].mxu0 %v1351_v17  ;;  %2706 = vmatprep.mubr.msk.bf16.mxu1 %vm3305_vm0, %v3304_v1  ;;  %v1566_v17 = vshrl.u32 %v2464_v62, 16 }
  0x51   : > { %2867 = vmatpush3.bf16.msra.mxu0 %v3217_v18  ;;  %2850 = vmatprep.mubr.msk.bf16.mxu0 %vm3305_vm0, %v3304_v1  ;;  %v1570_v18 = vrot.slane %v1568_v4, 1  ;;  %v754_v27 = vor.u32 %v753_v16, %v749_v8  ;;  %v3258_v16 = vld [vmem:[%s3920_s1 + $0xe0] sm:$0xff]  }
  0x52   : > { %2868 = vmatprep.subr.bf16.mxu0 %v3304_v1  ;;  %2723 = vmatpush3.bf16.msra.mxu1 %v3221_v22  ;;  %v1993_v22 = vrot.slane %v3654_v11, 1 }
  0x53   : > { %2724 = vmatprep.subr.bf16.mxu1 %v3304_v1  ;;  %v1571_v29 = vor.u32 %v1570_v18, %v1566_v17 }
  0x54   : > { %v3667_v25 = vsel %vm551_vm2, %v1991_v19, %v1993_v22  ;;  %v3672_v26 = vsel %vm551_vm2, %v1993_v22, %v1995_v20 }
  0x55   : > { %2869 = vmatpush3.bf16.msra.mxu0 %v3218_v23  ;;  %v758_v23 = vrot.slane %v756_v9, 1  ;;  %v3255_v9 = vld [vmem:[%s3920_s1 + $0x1e0] sm:$0xff]  }
  0x56   : > { %2870 = vmatprep.subr.bf16.mxu0 %v3304_v1  ;;  %2725 = vmatpush3.bf16.msra.mxu1 %v3223_v30  ;;  %v1575_v30 = vrot.slane %v1573_v10, 1  ;;  %v1593_v10 = vshrl.u32 %v3657_v14, 16 }
  0x57   : > { %2707 = vmatmul.mubr.bf16.gmra.mrb[4].mxu1 %v556_v32  ;;  %2726 = vmatprep.subr.bf16.mxu1 %v3304_v1  ;;  %v760_v32 = vshrl.u32 %v3240_v0, 16  ;;  %v3252_v0 = vld [vmem:[%s3920_s1 + $0x1d8] sm:$0xff]  }
  0x58   : > { %2851 = vmatmul.mubr.bf16.gmra.mrb[4].mxu0 %v1360_v35  ;;  %2710 = vmatprep.mubr.msk.bf16.mxu1 %vm3305_vm0, %v3304_v1  ;;  %v759_v35 = vsel %vm747_vm5, %v754_v27, %v758_v23  ;;  %v1576_v36 = vsel %vm747_vm5, %v1571_v29, %v1575_v30 }
  0x59   : > { %2871 = vmatpush3.bf16.msra.mxu0 %v3222_v31  ;;  %2854 = vmatprep.mubr.msk.bf16.mxu0 %vm3305_vm0, %v3304_v1  ;;  %v930_v31 = vld [vmem:[%s3397_s16 + $0x7c] sm:$0x3] }
  0x5a   : > { %2872 = vmatprep.subr.bf16.mxu0 %v3304_v1  ;;  %2727 = vmatpush3.bf16.msra.mxu1 %v3227_v38  ;;  %v2385_v34 = vcombine.low %v3563_v28, %v930_v31  ;;  %v1577_v38 = vshrl.u32 %v3638_v2, 16  ;;  %v1969_v28 = vld [vmem:[%s3397_s16 + $0x4] sm:$0xe]  ;;  %v3265_v31 = vld [vmem:[%s3397_s16 + $0x30] sm:$0xfe]  }
  0x5b   : > { %2728 = vmatprep.subr.bf16.mxu1 %v3304_v1  ;;  %v3739_v2 = vld [vmem:[%s3397_s16 + $0x24] sm:$0x1f]  }
  0x5c   : > { %v3687_v40 = vrot.slane %v2385_v34, 2  ;;  %v1579_v12 = vor.u32 %v1577_v38, %v1575_v30  ;;  %v3261_v30 = vld [vmem:[%s3920_s1 + $0x1f0] sm:$0xff]   ;;  %v784_v34 = vshrl.u32 %v3731_v61, 16  ;;  %v1795_v38 = vshll.u32 %v3265_v31, 16 }
  0x5d   : > { %2873 = vmatpush3.bf16.msra.mxu0 %v3226_v43  ;;  %v2522_v43 = vcombine.low %v1969_v28, %v3618_v56  ;;  %v1585_v56 = vshrl.u32 %v3654_v11, 16  ;;  %v1597_v11 = vshll.u32 %v3739_v2, 16  ;;  %v3264_v28 = vld [vmem:[%s3920_s1 + $0xf8] sm:$0xff]  }
  0x5e   : > { %2874 = vmatprep.subr.bf16.mxu0 %v3304_v1  ;;  %2729 = vmatpush3.bf16.msra.mxu1 %v3228_v44  ;;  %v3697_v42 = vsel %vm973_vm3, %v979_v15, %v3687_v40  ;;  %v762_v44 = vor.u32 %v760_v32, %v758_v23  ;;  %v1583_v15 = vrot.slane %v1581_v39, 1  ;;  %v3259_v23 = vld [vmem:[%s3920_s1 + $0x1e8] sm:$0xff]   ;;  %v3266_v32 = vld [vmem:[%s3397_s16 + $0x38] sm:$0xff]  }
  0x5f   : > { %2711 = vmatmul.mubr.bf16.gmra.mrb[8].mxu1 %v558_v46  ;;  %2730 = vmatprep.subr.bf16.mxu1 %v3304_v1  ;;  %v3250_v46 = vld [vmem:[%s3397_s16 + $0x18] sm:$0xff]   ;;  %v1990_v48 = vrot.slane %v2522_v43, 1  ;;  %v1599_v22 = vrot.slane %v1597_v11, 1  ;;  %v1800_v39 = vshrl.u32 %v3266_v32, 16 }
  0x60   : > { %2855 = vmatmul.mubr.bf16.gmra.mrb[8].mxu0 %v1369_v50  ;;  %2714 = vmatprep.mubr.msk.bf16.mxu1 %vm3305_vm0, %v3304_v1  ;;  %v1584_v54 = vsel %vm747_vm5, %v1579_v12, %v1583_v15  ;;  %v1587_v62 = vor.u32 %v1585_v56, %v1583_v15  ;;  %v3269_v15 = vld [vmem:[%s3397_s16 + $0x40] sm:$0xff]  }
  0x61   : > { %2875 = vmatpush3.bf16.msra.mxu0 %v3229_v47  ;;  %2858 = vmatprep.mubr.msk.bf16.mxu0 %vm3305_vm0, %v3304_v1  ;;  %v3244_v47 = vld [vmem:[%s3920_s1 + $0x1c8] sm:$0xff]   ;;  %v3714_v50 = vsel %vm551_vm2, %v1990_v48, %v1991_v19 }
  0x62   : > { %2731 = vmatpush3.bf16.msra.mxu1 %v3232_v51  ;;  %2876 = vmatprep.subr.bf16.mxu0 %v3304_v1  ;;  %v767_v51 = vsel %vm747_vm5, %v762_v44, %v766_v45 }
  0x63   : > { %2732 = vmatprep.subr.bf16.mxu1 %v3304_v1 }
  0x65   : > { %2877 = vmatpush3.bf16.msra.mxu0 %v3233_v53  ;;  %v772_v53 = vshll.u32 %v3250_v46, 16 }
  0x66   : > { %2733 = vmatpush3.bf16.msra.mxu1 %v3234_v57  ;;  %2878 = vmatprep.subr.bf16.mxu0 %v3304_v1  ;;  %v1589_v57 = vshll.u32 %v3657_v14, 16 }
  0x67   : > { %2715 = vmatmul.mubr.bf16.gmra.mrb[12].mxu1 %v560_v59  ;;  %2734 = vmatprep.subr.bf16.mxu1 %v3304_v1 }
  0x68   : > { %2859 = vmatmul.mubr.bf16.gmra.mrb[12].mxu0 %v1378_v63  ;;  %2718 = vmatprep.mubr.msk.bf16.mxu1 %vm3305_vm0, %v3304_v1  ;;  %v1591_v63 = vrot.slane %v1589_v57, 1  ;;  %v3271_v57 = vld [vmem:[%s3397_s16 + $0x48] sm:$0xff]  }
  0x69   : > { %2862 = vmatprep.mubr.msk.bf16.mxu0 %vm3305_vm0, %v3304_v1  ;;  %2879 = vmatpush3.bf16.msra.mxu0 %v3235_v58  ;;  %v3253_v58 = vld [vmem:[%s3920_s1 + $0xd0] sm:$0xff]  }
  0x6a   : > { %2735 = vmatpush3.bf16.msra.mxu1 %v3236_v60  ;;  %2880 = vmatprep.subr.bf16.mxu0 %v3304_v1  ;;  %v774_v60 = vrot.slane %v772_v53, 1  ;;  %v1592_v8 = vsel %vm747_vm5, %v1587_v62, %v1591_v63  ;;  %v1595_v19 = vor.u32 %v1593_v10, %v1591_v63  ;;  %v3270_v62 = vld [vmem:[%s3920_s1 + $0x210] sm:$0xff]  }
  0x6b   : > { %2736 = vmatprep.subr.bf16.mxu1 %v3304_v1 }
  0x6c   : > { %v1600_v29 = vsel %vm747_vm5, %v1595_v19, %v1599_v22  ;;  %v3278_v19 = vld [vmem:[%s3920_s1 + $0x238] sm:$0xff]  }
  0x6d   : > { %2881 = vmatpush3.bf16.msra.mxu0 %v3237_v5  ;;  %v776_v5 = vshrl.u32 %v3250_v46, 16  ;;  %v1797_v46 = vrot.slane %v1795_v38, 2 }
  0x6e   : > { %2737 = vmatpush3.bf16.msra.mxu1 %v3238_v7  ;;  %2902 = vmatprep.subr.bf16.mxu0 %v3304_v1  ;;  %v780_v7 = vshll.u32 %v3731_v61, 16  ;;  %v1821_v61 = vshll.u32 %v3271_v57, 16 }
  0x6f   : > { %2719 = vmatmul.mubr.bf16.gmra.mrb[16].mxu1 %v559_v52  ;;  %2758 = vmatprep.subr.bf16.mxu1 %v3304_v1  ;;  %v768_v52 = vshrl.u32 %v3245_v24, 16  ;;  %v778_v17 = vor.u32 %v776_v5, %v774_v60  ;;  %v3260_v24 = vld [vmem:[%s3920_s1 + $0xe8] sm:$0xff]   ;;  %v3272_v5 = vld [vmem:[%s3920_s1 + $0x218] sm:$0xff]  }
  0x70   : > { %2863 = vmatmul.mubr.bf16.gmra.mrb[16].mxu0 %v1377_v55  ;;  %2738 = vmatprep.mubr.msk.bf16.mxu1 %vm3305_vm0, %v3304_v1  ;;  %v3248_v55 = vld [vmem:[%s3920_s1 + $0x1d0] sm:$0xff]   ;;  %v782_v18 = vrot.slane %v780_v7, 1 }
  0x71   : > { %2882 = vmatprep.mubr.msk.bf16.mxu0 %vm3305_vm0, %v3304_v1  ;;  %v770_v59 = vor.u32 %v768_v52, %v766_v45  ;;  %v1812_v52 = vshll.u32 %v3269_v15, 16 }
  0x72   : > { %v783_v27 = vsel %vm747_vm5, %v778_v17, %v782_v18  ;;  %v786_v43 = vor.u32 %v784_v34, %v782_v18  ;;  %v3276_v17 = vld [vmem:[%s3920_s1 + $0x228] sm:$0xff]   ;;  %v3277_v18 = vld [vmem:[%s3920_s1 + $0x230] sm:$0xff]  }
  0x73   : > { %v775_v4 = vsel %vm747_vm5, %v770_v59, %v774_v60  ;;  %v1814_v56 = vrot.slane %v1812_v52, 2  ;;  %v1818_v60 = vshrl.u32 %v3271_v57, 16 }
  0x75   : > { %v1820_v63 = vrot.slane %v1818_v60, 1 }
  0x77   : > { %2739 = vmatmul.mubr.bf16.vlgmr.msra.gmra.mrb[0].mxu1 %v759_v35  ;;  %v1601_v35 = vshrl.u32 %v3739_v2, 16 }
  0x78   : > { %2883 = vmatmul.mubr.bf16.vlgmr.msra.gmra.mrb[0].mxu0 %v1576_v36  ;;  %2742 = vmatprep.mubr.msk.bf16.mxu1 %vm3305_vm0, %v3304_v1  ;;  %v3263_v36 = vld [vmem:[%s3920_s1 + $0x1f8] sm:$0xff]  }
  0x79   : > { %2903 = vmatpush3.bf16.msra.mxu0 %v3243_v37  ;;  %2886 = vmatprep.mubr.msk.bf16.mxu0 %vm3305_vm0, %v3304_v1  ;;  %v1792_v37 = vshrl.u32 %v3265_v31, 16  ;;  %v1603_v44 = vor.u32 %v1601_v35, %v1599_v22 }
  0x7a   : > { %2904 = vmatprep.subr.bf16.mxu0 %v3304_v1  ;;  %2759 = vmatpush3.bf16.msra.mxu1 %v3247_v41  ;;  %v1803_v41 = vshll.u32 %v3266_v32, 16 }
  0x7b   : > { %2760 = vmatprep.subr.bf16.mxu1 %v3304_v1  ;;  %v1794_v45 = vrot.slane %v1792_v37, 1 }
  0x7c   : > { %v1805_v12 = vrot.slane %v1803_v41, 2 }
  0x7d   : > { %2905 = vmatpush3.bf16.msra.mxu0 %v3244_v47  ;;  %v1802_v47 = vrot.slane %v1800_v39, 1  ;;  %v1798_v48 = vor.u32 %v1797_v46, %v1794_v45 }
  0x7e   : > { %2906 = vmatprep.subr.bf16.mxu0 %v3304_v1  ;;  %2761 = vmatpush3.bf16.msra.mxu1 %v3249_v49 }
  0x7f   : > { %2743 = vmatmul.mubr.bf16.gmra.mrb[4].mxu1 %v767_v51  ;;  %2762 = vmatprep.subr.bf16.mxu1 %v3304_v1  ;;  %v1806_v49 = vor.u32 %v1805_v12, %v1802_v47  ;;  %v1809_v51 = vshrl.u32 %v3269_v15, 16 }
  0x80   : > { %2887 = vmatmul.mubr.bf16.gmra.mrb[4].mxu0 %v1584_v54  ;;  %2746 = vmatprep.mubr.msk.bf16.mxu1 %vm3305_vm0, %v3304_v1  ;;  %v3267_v54 = vld [vmem:[%s3920_s1 + $0x200] sm:$0xff]  }
  0x81   : > { %2907 = vmatpush3.bf16.msra.mxu0 %v3248_v55  ;;  %2890 = vmatprep.mubr.msk.bf16.mxu0 %vm3305_vm0, %v3304_v1  ;;  %v1807_v53 = vsel %vm1790_vm6, %v1798_v48, %v1806_v49  ;;  %v1811_v55 = vrot.slane %v1809_v51, 1 }
  0x82   : > { %2908 = vmatprep.subr.bf16.mxu0 %v3304_v1  ;;  %2763 = vmatpush3.bf16.msra.mxu1 %v3253_v58  ;;  %v3268_v58 = vld [vmem:[%s3920_s1 + $0x208] sm:$0xff]  }
  0x83   : > { %2764 = vmatprep.subr.bf16.mxu1 %v3304_v1  ;;  %v1815_v59 = vor.u32 %v1814_v56, %v1811_v55 }
  0x85   : > { %2909 = vmatpush3.bf16.msra.mxu0 %v3252_v0  ;;  %v1823_v0 = vrot.slane %v1821_v61, 2 }
  0x86   : > { %2910 = vmatprep.subr.bf16.mxu0 %v3304_v1  ;;  %2765 = vmatpush3.bf16.msra.mxu1 %v3254_v3  ;;  %v3275_v3 = vld [vmem:[%s3397_s16 + $0x50] sm:$0x3f]  }
  0x87   : > { %2747 = vmatmul.mubr.bf16.gmra.mrb[8].mxu1 %v775_v4  ;;  %2766 = vmatprep.subr.bf16.mxu1 %v3304_v1  ;;  %v1824_v4 = vor.u32 %v1823_v0, %v1820_v63  ;;  %v1827_v7 = vshrl.u32 %v3275_v3, 16 }
  0x88   : > { %2891 = vmatmul.mubr.bf16.gmra.mrb[8].mxu0 %v1592_v8  ;;  %2750 = vmatprep.mubr.msk.bf16.mxu1 %vm3305_vm0, %v3304_v1  ;;  %v1830_v8 = vshll.u32 %v3275_v3, 16 }
  0x89   : > { %2911 = vmatpush3.bf16.msra.mxu0 %v3255_v9  ;;  %2894 = vmatprep.mubr.msk.bf16.mxu0 %vm3305_vm0, %v3304_v1  ;;  %v3273_v9 = vld [vmem:[%s3920_s1 + $0x220] sm:$0xff]   ;;  %v1829_v10 = vrot.slane %v1827_v7, 1 }
  0x8a   : > { %2767 = vmatpush3.bf16.msra.mxu1 %v3258_v16  ;;  %2912 = vmatprep.subr.bf16.mxu0 %v3304_v1  ;;  %v1832_v11 = vrot.slane %v1830_v8, 2 }
  0x8b   : > { %2768 = vmatprep.subr.bf16.mxu1 %v3304_v1 }
  0x8c   : > { %v1833_v16 = vor.u32 %v1832_v11, %v1829_v10 }
  0x8d   : > { %2913 = vmatpush3.bf16.msra.mxu0 %v3259_v23 }
  0x8e   : > { %2769 = vmatpush3.bf16.msra.mxu1 %v3260_v24  ;;  %2914 = vmatprep.subr.bf16.mxu0 %v3304_v1 }
  0x8f   : > { %2751 = vmatmul.mubr.bf16.gmra.mrb[12].mxu1 %v783_v27  ;;  %2770 = vmatprep.subr.bf16.mxu1 %v3304_v1 }
  0x90   : > { %2895 = vmatmul.mubr.bf16.gmra.mrb[12].mxu0 %v1600_v29  ;;  %2754 = vmatprep.mubr.msk.bf16.mxu1 %vm3305_vm0, %v3304_v1 }
  0x91   : > { %2898 = vmatprep.mubr.msk.bf16.mxu0 %vm3305_vm0, %v3304_v1  ;;  %2915 = vmatpush3.bf16.msra.mxu0 %v3261_v30 }
  0x92   : > { %2771 = vmatpush3.bf16.msra.mxu1 %v3262_v33  ;;  %2916 = vmatprep.subr.bf16.mxu0 %v3304_v1 }
  0x93   : > { %2772 = vmatprep.subr.bf16.mxu1 %v3304_v1 }
  0x95   : > { %2917 = vmatpush3.bf16.msra.mxu0 %v3263_v36 }
  0x96   : > { %2773 = vmatpush3.bf16.msra.mxu1 %v3264_v28  ;;  %2938 = vmatprep.subr.bf16.mxu0 %v3304_v1 }
  0x97   : > { %2755 = vmatmul.mubr.bf16.gmra.mrb[16].mxu1 %v786_v43  ;;  %2974 = vmatprep.subr.bf16.mxu1 %v3304_v1 }
  0x98   : > { %2899 = vmatmul.mubr.bf16.gmra.mrb[16].mxu0 %v1603_v44  ;;  %2774 = vmatprep.mubr.msk.bf16.mxu1 %vm3305_vm0, %v3304_v1 }
  0x99   : > { %2918 = vmatprep.mubr.msk.bf16.mxu0 %vm3305_vm0, %v3304_v1 }
  0x9f   : > { %2775 = vmatmul.mubr.bf16.vlgmr.msra.gmra.mrb[0].mxu1 %v3528_v6  ;;  %v1816_v6 = vsel %vm1790_vm6, %v1806_v49, %v1815_v59 }
  0xa0   : > { %2919 = vmatmul.mubr.bf16.vlgmr.msra.gmra.mrb[0].mxu0 %v1807_v53  ;;  %2778 = vmatprep.mubr.msk.bf16.mxu1 %vm3305_vm0, %v3304_v1 }
  0xa1   : > { %2939 = vmatpush3.bf16.msra.mxu0 %v3267_v54  ;;  %2922 = vmatprep.mubr.msk.bf16.mxu0 %vm3305_vm0, %v3304_v1 }
  0xa2   : > { %2940 = vmatprep.subr.bf16.mxu0 %v3304_v1  ;;  %2982 = vmatpush3.bf16.msra.mxu1 %v3267_v54 }
  0xa3   : > { %2975 = vmatprep.subr.bf16.mxu1 %v3304_v1 }
  0xa5   : > { %2941 = vmatpush3.bf16.msra.mxu0 %v3268_v58 }
  0xa6   : > { %2942 = vmatprep.subr.bf16.mxu0 %v3304_v1  ;;  %2983 = vmatpush3.bf16.msra.mxu1 %v3268_v58 }
  0xa7   : > { %2779 = vmatmul.mubr.bf16.gmra.mrb[4].mxu1 %v3536_v13  ;;  %2976 = vmatprep.subr.bf16.mxu1 %v3304_v1  ;;  %v1825_v13 = vsel %vm1790_vm6, %v1815_v59, %v1824_v4 }
  0xa8   : > { %2923 = vmatmul.mubr.bf16.gmra.mrb[4].mxu0 %v1816_v6  ;;  %2782 = vmatprep.mubr.msk.bf16.mxu1 %vm3305_vm0, %v3304_v1 }
  0xa9   : > { %2943 = vmatpush3.bf16.msra.mxu0 %v3270_v62  ;;  %2926 = vmatprep.mubr.msk.bf16.mxu0 %vm3305_vm0, %v3304_v1 }
  0xaa   : > { %2944 = vmatprep.subr.bf16.mxu0 %v3304_v1  ;;  %2984 = vmatpush3.bf16.msra.mxu1 %v3270_v62 }
  0xab   : > { %2977 = vmatprep.subr.bf16.mxu1 %v3304_v1 }
  0xad   : > { %2945 = vmatpush3.bf16.msra.mxu0 %v3272_v5 }
  0xae   : > { %2946 = vmatprep.subr.bf16.mxu0 %v3304_v1  ;;  %2985 = vmatpush3.bf16.msra.mxu1 %v3272_v5 }
  0xaf   : > { %2783 = vmatmul.mubr.bf16.gmra.mrb[8].mxu1 %v3548_v21  ;;  %2978 = vmatprep.subr.bf16.mxu1 %v3304_v1  ;;  %v1834_v21 = vsel %vm1790_vm6, %v1824_v4, %v1833_v16 }
  0xb0   : > { %2927 = vmatmul.mubr.bf16.gmra.mrb[8].mxu0 %v1825_v13  ;;  %2786 = vmatprep.mubr.msk.bf16.mxu1 %vm3305_vm0, %v3304_v1 }
  0xb1   : > { %2947 = vmatpush3.bf16.msra.mxu0 %v3273_v9  ;;  %2930 = vmatprep.mubr.msk.bf16.mxu0 %vm3305_vm0, %v3304_v1 }
  0xb2   : > { %2986 = vmatpush3.bf16.msra.mxu1 %v3273_v9  ;;  %2948 = vmatprep.subr.bf16.mxu0 %v3304_v1 }
  0xb3   : > { %2979 = vmatprep.subr.bf16.mxu1 %v3304_v1 }
  0xb5   : > { %2949 = vmatpush3.bf16.msra.mxu0 %v3276_v17 }
  0xb6   : > { %2987 = vmatpush3.bf16.msra.mxu1 %v3276_v17  ;;  %2950 = vmatprep.subr.bf16.mxu0 %v3304_v1 }
  0xb7   : > { %2787 = vmatmul.mubr.bf16.gmra.mrb[12].mxu1 %v3697_v42  ;;  %2980 = vmatprep.subr.bf16.mxu1 %v3304_v1  ;;  %v1997_v42 = vrot.slane %v3739_v2, 1 }
  0xb8   : > { %2931 = vmatmul.mubr.bf16.gmra.mrb[12].mxu0 %v1834_v21  ;;  %2790 = vmatprep.mubr.msk.bf16.mxu1 %vm3305_vm0, %v3304_v1 }
  0xb9   : > { %2934 = vmatprep.mubr.msk.bf16.mxu0 %vm3305_vm0, %v3304_v1  ;;  %2951 = vmatpush3.bf16.msra.mxu0 %v3277_v18  ;;  %v1998_v22 = vsel %vm551_vm2, %v1995_v20, %v1997_v42 }
  0xba   : > { %2988 = vmatpush3.bf16.msra.mxu1 %v3277_v18  ;;  %2952 = vmatprep.subr.bf16.mxu0 %v3304_v1 }
  0xbb   : > { %2981 = vmatprep.subr.bf16.mxu1 %v3304_v1 }
  0xbd   : > { %2953 = vmatpush3.bf16.msra.mxu0 %v3278_v19 }
  0xbe   : > { %2989 = vmatpush3.bf16.msra.mxu1 %v3278_v19 }
  0xbf   : > { %2791 = vmatmul.mubr.bf16.gmra.mrb[16].mxu1 %v3687_v40 }
  0xc0   : > { %2935 = vmatmul.mubr.bf16.gmra.mrb[16].mxu0 %v1833_v16  ;;  %2966 = vmatprep.mubr.msk.bf16.mxu1 %vm3305_vm0, %v3304_v1 }
  0xc1   : > { %2954 = vmatprep.mubr.msk.bf16.mxu0 %vm3305_vm0, %v3304_v1 }
  0xc7   : > { %2967 = vmatmul.mubr.bf16.vlgmr.msra.gmra.mrb[20].mxu1 %v1998_v22 }
  0xc8   : > { %2955 = vmatmul.mubr.bf16.vlgmr.msra.gmra.mrb[0].mxu0 %v3714_v50  ;;  %2970 = vmatprep.mubr.msk.bf16.mxu1 %vm3305_vm0, %v3304_v1 }
  0xc9   : > { %2958 = vmatprep.mubr.msk.bf16.mxu0 %vm3305_vm0, %v3304_v1 }
  0xcf   : > { %2971 = vmatmul.mubr.bf16.gmra.mrb[24].mxu1 %v1997_v42 }
  0xd0   : > { %2959 = vmatmul.mubr.bf16.gmra.mrb[4].mxu0 %v3667_v25 }
  0xd1   : > { %2962 = vmatprep.mubr.msk.bf16.mxu0 %vm3305_vm0, %v3304_v1  ;;  %v2293_v1 = vld [vmem:[%s3921_s2] ss:$0 sm:$0xff] }
  0xd8   : > { %2963 = vmatmul.mubr.bf16.gmra.mrb[8].mxu0 %v3672_v26 }
 0x172   : > { %v1070_v14 = vpop.f32.mrb[0].mxu1 }
 0x173   : > { %v2776_v40 = vpop.f32.mrb[1].mxu1  ;;  %v2990_v53 = vadd.f32 %v2293_v1, %v1070_v14 }
 0x174   : > { %v1073_v20 = vpop.f32.mrb[2].mxu1 }
 0x175   : > { %v2777_v2 = vpop.f32.mrb[3].mxu1  ;;  %v2992_v58 = vadd.f32 %v2293_v1, %v1073_v20 }
 0x17a   : > { %v1078_v23 = vpop.f32.mrb[4].mxu1 }
 0x17b   : > { %v2780_v50 = vpop.f32.mrb[5].mxu1  ;;  %v2994_v4 = vadd.f32 %v2293_v1, %v1078_v23 }
 0x17c   : > { %v1081_v24 = vpop.f32.mrb[6].mxu1 }
 0x17d   : > { %v2781_v27 = vpop.f32.mrb[7].mxu1  ;;  %v2996_v9 = vadd.f32 %v2293_v1, %v1081_v24 }
 0x182   : > { %v3886_v29 = vpop.f32.mrb[8].mxu1 }
 0x183   : > { %v2784_v30 = vpop.f32.mrb[9].mxu1  ;;  %v2998_v42 = vadd.f32 %v2293_v1, %v3886_v29 }
 0x184   : > { %v3888_v31 = vpop.f32.mrb[10].mxu1 }
 0x185   : > { %v2785_v32 = vpop.f32.mrb[11].mxu1  ;;  %v3000_v14 = vadd.f32 %v2293_v1, %v3888_v31 }
 0x18a   : > { %v1094_v25 = vpop.f32.mrb[12].mxu1 }
 0x18b   : > { %v3002_v26 = vadd.f32 %v2293_v1, %v1094_v25  ;;  %v1946_v33 = vpop.f32.mrb[12].mxu0  ;;  %v2788_v34 = vpop.f32.mrb[13].mxu1 }
 0x18c   : > { %v2932_v35 = vpop.f32.mrb[13].mxu0  ;;  %v1097_v36 = vpop.f32.mrb[14].mxu1 }
 0x18d   : > { %v3003_v37 = vadd.f32 %v3002_v26, %v1946_v33  ;;  %v3005_v38 = vadd.f32 %v2293_v1, %v1097_v36  ;;  %v1949_v39 = vpop.f32.mrb[14].mxu0  ;;  %v2789_v41 = vpop.f32.mrb[15].mxu1 }
 0x18e   : > { %v2933_v28 = vpop.f32.mrb[15].mxu0 }
 0x18f   : > { %v3006_v43 = vadd.f32 %v3005_v38, %v1949_v39 }
 0x192   : > { %v1102_v44 = vpop.f32.mrb[16].mxu1 }
 0x193   : > { %v3008_v45 = vadd.f32 %v2293_v1, %v1102_v44  ;;  %v1954_v46 = vpop.f32.mrb[16].mxu0  ;;  %v2792_v47 = vpop.f32.mrb[17].mxu1 }
 0x194   : > { %v2936_v12 = vpop.f32.mrb[17].mxu0  ;;  %v1105_v15 = vpop.f32.mrb[18].mxu1 }
 0x195   : > { %v3009_v48 = vadd.f32 %v3008_v45, %v1954_v46  ;;  %v1957_v49 = vpop.f32.mrb[18].mxu0  ;;  %v2793_v51 = vpop.f32.mrb[19].mxu1 }
 0x196   : > { %v2937_v52 = vpop.f32.mrb[19].mxu0 }
 0x19a   : > { %v2110_v54 = vpop.f32.mrb[20].mxu1 }
 0x19b   : > { %v2086_v55 = vpop.f32.mrb[0].mxu0  ;;  %v3004_v56 = vadd.f32 %v3003_v37, %v2110_v54  ;;  %v2968_v57 = vpop.f32.mrb[21].mxu1 }
 0x19c   : > { %v2991_v59 = vadd.f32 %v2990_v53, %v2086_v55  ;;  %v2956_v60 = vpop.f32.mrb[1].mxu0  ;;  %v2113_v61 = vpop.f32.mrb[22].mxu1 }
 0x19d   : > { %2139 = vst [vmem:[%s3897_s8 + $0x30] sm:$0xff] %v3004_v56  ;;  %v2089_v6 = vpop.f32.mrb[2].mxu0  ;;  %v3007_v62 = vadd.f32 %v3006_v43, %v2113_v61  ;;  %v2969_v63 = vpop.f32.mrb[23].mxu1 }
 0x19e   : > { %2133 = vst [vmem:[%s3897_s8] sm:$0xff] %v2991_v59  ;;  %v2993_v0 = vadd.f32 %v2992_v58, %v2089_v6  ;;  %v2957_v3 = vpop.f32.mrb[3].mxu0 }
 0x19f   : > { %2140 = vst [vmem:[%s3897_s8 + $0x38] sm:$0xff] %v3007_v62 }
 0x1a0   : > { %2134 = vst [vmem:[%s3897_s8 + $0x8] sm:$0xff] %v2993_v0 }
 0x1a2   : > { %v2118_v5 = vpop.f32.mrb[24].mxu1 }
 0x1a3   : > { %v2094_v7 = vpop.f32.mrb[4].mxu0  ;;  %v3010_v8 = vadd.f32 %v3009_v48, %v2118_v5  ;;  %v2972_v13 = vpop.f32.mrb[25].mxu1 }
 0x1a4   : > { %v2995_v10 = vadd.f32 %v2994_v4, %v2094_v7  ;;  %v2960_v11 = vpop.f32.mrb[5].mxu0  ;;  %v2121_v16 = vpop.f32.mrb[26].mxu1 }
 0x1a5   : > { %2141 = vst [vmem:[%s3897_s8 + $0x40] sm:$0xff] %v3010_v8  ;;  %v2097_v17 = vpop.f32.mrb[6].mxu0  ;;  %v2973_v21 = vpop.f32.mrb[27].mxu1 }
 0x1a6   : > { %2135 = vst [vmem:[%s3897_s8 + $0x10] sm:$0xff] %v2995_v10  ;;  %v2997_v18 = vadd.f32 %v2996_v9, %v2097_v17  ;;  %v2961_v19 = vpop.f32.mrb[7].mxu0 }
 0x1a8   : > { %2136 = vst [vmem:[%s3897_s8 + $0x18] sm:$0xff] %v2997_v18 }
 0x1ab   : > { %v2102_v22 = vpop.f32.mrb[8].mxu0 }
 0x1ac   : > { %v2999_v40 = vadd.f32 %v2998_v42, %v2102_v22  ;;  %v2964_v20 = vpop.f32.mrb[9].mxu0 }
 0x1ad   : > { %v2105_v2 = vpop.f32.mrb[10].mxu0 }
 0x1ae   : > { %2137 = vst [vmem:[%s3897_s8 + $0x20] sm:$0xff] %v2999_v40  ;;  %v3001_v23 = vadd.f32 %v3000_v14, %v2105_v2  ;;  %v2965_v50 = vpop.f32.mrb[11].mxu0 }
 0x1b0   : > { %2138 = vst [vmem:[%s3897_s8 + $0x28] sm:$0xff] %v3001_v23 }
 0x1b1 PF: > { %s13_s14 = sadd.s32 1, %s3302_s14   ;;  %s3923_s12 = smov %s3298_s13 }
 0x1b2   : > { %p10_p5 = scmp.ge.s32.totalorder %s13_s14, 4   ;;  %s3924_s13 = smov %s3926_s15 }
 0x1b4   :  { %12 = sbr.rel (!%p10_p5) target bundleno = 2 (0x2), region = 80 }

</bundles_post_ra>
